<compile_context>
chip_gen: v6e
topology: v6e:2x2x1
jax: 0.10.0
libtpu: 0.0.40
codegen_flags: <defaults>
</compile_context>

<pallas_src>
import functools

import jax
import jax.numpy as jnp
from jax.experimental import pallas as pl
from jax.experimental.pallas import tpu as pltpu


def discriminator_kernel(x_ref,
                         w1_ref, w2_ref, w3_ref, w4_ref, w5_ref,
                         b_ref, out_ref, *, out_dims, slope=0.2):
    h = x_ref[...]
    w_refs = (w1_ref, w2_ref, w3_ref, w4_ref, w5_ref)
    n = len(w_refs)
    for i, w_ref in enumerate(w_refs):
        w = w_ref[...]
        b = b_ref[i:i + 1, 0:out_dims[i]]                     # (1, out_i)
        h = jnp.dot(h.astype(w.dtype), w,
                    preferred_element_type=jnp.float32) + b
        if i < n - 1:                                         # LeakyReLU(0.2), layers 1-4 only
            h = jnp.where(h > 0, h, slope * h)

    # Numerically stable softmax over the feature axis (dim=1).
    m = jnp.max(h, axis=-1, keepdims=True)
    e = jnp.exp(h - m)
    denom = jnp.sum(e, axis=-1, keepdims=True)
    # Approx reciprocal (EUP slot, off the VALU path) + one Newton refinement.
    r = pl.reciprocal(denom, approx=True)
    r = r * (2.0 - denom * r)
    out_ref[...] = e * r


def _pick_batch_tile(B):
    if B <= 512:
        return B                      # collapse grid: single invocation, no per-step overhead
    for t in (512, 256, 128, 64, 32, 16, 8):
        if B % t == 0:
            return t
    return B


def discriminator_forward(x, params, *, batch_tile=None, matmul_dtype=None):
    """x: (B, D) float32.  params: list of 5 (W, b); W is (in, out), b is (1, out)."""
    B, D = x.shape
    n_layers = len(params)
    assert n_layers == 5
    out_dims = tuple(int(w.shape[1]) for (w, _) in params)
    assert max(out_dims) <= D

    if batch_tile is None:
        batch_tile = _pick_batch_tile(B)
    assert B % batch_tile == 0
    grid = (B // batch_tile,)

    # Optionally ship bf16 weights (accumulation stays f32 inside the kernel).
    w_dtype = jnp.dtype(matmul_dtype) if matmul_dtype is not None else x.dtype
    ws = [w.astype(w_dtype) for (w, _) in params]

    # Pack the five (1, out_i) biases into one (n_layers, D) f32 array (zero-padded rows).
    b_pack = jnp.zeros((n_layers, D), jnp.float32)
    for i, (_, b) in enumerate(params):
        b_pack = b_pack.at[i, :out_dims[i]].set(b.reshape(-1).astype(jnp.float32))

    def full_spec(arr):
        return pl.BlockSpec(arr.shape, lambda i: (0, 0))

    in_specs = [pl.BlockSpec((batch_tile, D), lambda i: (i, 0))]
    in_specs += [full_spec(w) for w in ws]
    in_specs += [full_spec(b_pack)]
    out_spec = pl.BlockSpec((batch_tile, D), lambda i: (i, 0))

    # VMEM footprint guard (params are double-buffered only when grid > 1).
    itemsize = jnp.dtype(w_dtype).itemsize
    param_bytes = sum(int(w.size) for w in ws) * itemsize + int(b_pack.size) * 4
    io_bytes = 2 * batch_tile * D * 4
    bufs = 1 if grid[0] == 1 else 2
    est = bufs * (param_bytes + io_bytes) + 4 * batch_tile * D * 4
    assert est < (60 << 20), "parameters too large to keep fully VMEM-resident"
    # TODO(synk): for very large input_dim, tile W4/W5 over the output (N) dim with a
    # K-reduction grid axis instead of keeping them fully VMEM-resident.
    vmem_limit = min(2 * est, 64 << 20) if est > (28 << 20) else None

    kernel = functools.partial(discriminator_kernel, out_dims=out_dims)
    return pl.pallas_call(
        kernel,
        out_shape=jax.ShapeDtypeStruct((B, D), jnp.float32),
        grid=grid,
        in_specs=in_specs,
        out_specs=out_spec,
        compiler_params=pltpu.CompilerParams(
            dimension_semantics=("parallel",),
            vmem_limit_bytes=vmem_limit),
    )(x, *ws, b_pack)


def init_params(key, input_dim):
    """Deterministic init mirroring nn.Linear default (uniform +/- 1/sqrt(fan_in))."""
    dims = [
        (input_dim, input_dim // 4),
        (input_dim // 4, input_dim // 8),
        (input_dim // 8, input_dim // 16),
        (input_dim // 16, input_dim),
        (input_dim, input_dim),
    ]
    params = []
    for (fan_in, fan_out) in dims:
        key, kw, kb = jax.random.split(key, 3)
        bound = 1.0 / jnp.sqrt(fan_in)
        w = jax.random.uniform(kw, (fan_in, fan_out), jnp.float32, -bound, bound)
        b = jax.random.uniform(kb, (1, fan_out), jnp.float32, -bound, bound)
        params.append((w, b))
    return params


def reference_forward(x, params):
    h = x
    for i, (w, b) in enumerate(params):
        h = h @ w + b
        if i < len(params) - 1:
            h = jnp.where(h > 0, h, 0.2 * h)
    return jax.nn.softmax(h, axis=1)


if __name__ == "__main__":
    key = jax.random.PRNGKey(0)
    B, D = 16, 64                      # batch=16, input_dim=64 (divisible by 16)
    kx, kp = jax.random.split(key)
    x = jax.random.normal(kx, (B, D), jnp.float32)
    params = init_params(kp, D)

    out = discriminator_forward(x, params)     # auto batch_tile -> grid=(1,)
    out = jax.block_until_ready(out)

    ref = reference_forward(x, params)
    assert out.shape == (B, D)
    # approx-reciprocal (+1 Newton step) softmax denominator -> compare at 1e-3.
    assert jnp.allclose(out, ref, atol=1e-3, rtol=1e-3), "mismatch vs JAX reference"
    # rows of a softmax sum to ~1
    assert jnp.allclose(jnp.sum(out, axis=1), jnp.ones((B,)), atol=1e-3)

    print("KERNEL_OK")
</pallas_src>

<mosaic_0001>
module attributes {stable_mosaic.version = 11 : i64} {
  func.func @discriminator_kernel(%arg0: i32, %arg1: memref<16x64xf32, #tpu.memory_space<vmem>>, %arg2: memref<64x16xf32, #tpu.memory_space<vmem>>, %arg3: memref<16x8xf32, #tpu.memory_space<vmem>>, %arg4: memref<8x4xf32, #tpu.memory_space<vmem>>, %arg5: memref<4x64xf32, #tpu.memory_space<vmem>>, %arg6: memref<64x64xf32, #tpu.memory_space<vmem>>, %arg7: memref<5x64xf32, #tpu.memory_space<vmem>>, %arg8: memref<16x64xf32, #tpu.memory_space<vmem>>) attributes {dimension_semantics = [#tpu.dimension_semantics<parallel>], iteration_bounds = array<i64: 1>, scalar_prefetch = 0 : i64, scratch_operands = 0 : i64, tpu.core_type = #tpu.core_type<tc>, window_params = [{transform_indices = @transform_0, window_bounds = array<i64: 16, 64>}, {pipeline_mode = #tpu.pipeline_mode<synchronous>, transform_indices = @transform_1, window_bounds = array<i64: 64, 16>}, {pipeline_mode = #tpu.pipeline_mode<synchronous>, transform_indices = @transform_2, window_bounds = array<i64: 16, 8>}, {pipeline_mode = #tpu.pipeline_mode<synchronous>, transform_indices = @transform_3, window_bounds = array<i64: 8, 4>}, {pipeline_mode = #tpu.pipeline_mode<synchronous>, transform_indices = @transform_4, window_bounds = array<i64: 4, 64>}, {pipeline_mode = #tpu.pipeline_mode<synchronous>, transform_indices = @transform_5, window_bounds = array<i64: 64, 64>}, {pipeline_mode = #tpu.pipeline_mode<synchronous>, transform_indices = @transform_6, window_bounds = array<i64: 5, 64>}, {transform_indices = @transform_7, window_bounds = array<i64: 16, 64>}]} {
    %c0 = arith.constant 0 : index
    %c0_0 = arith.constant 0 : index
    %0 = vector.load %arg1[%c0, %c0_0] : memref<16x64xf32, #tpu.memory_space<vmem>>, vector<16x64xf32>
    %c0_1 = arith.constant 0 : index
    %c0_2 = arith.constant 0 : index
    %1 = vector.load %arg2[%c0_1, %c0_2] : memref<64x16xf32, #tpu.memory_space<vmem>>, vector<64x16xf32>
    %c0_3 = arith.constant 0 : index
    %c0_4 = arith.constant 0 : index
    %2 = vector.load %arg7[%c0_3, %c0_4] : memref<5x64xf32, #tpu.memory_space<vmem>>, vector<1x16xf32>
    %cst = arith.constant dense<0.000000e+00> : vector<16x16xf32>
    %3 = tpu.matmul %0, %1, %cst {dimension_numbers = #tpu.dot_dimension_numbers<[1], [0], [0], [1], [0, 0, 1, 1], [], []>} : vector<16x64xf32>, vector<64x16xf32>, vector<16x16xf32> -> vector<16x16xf32>
    %4 = vector.broadcast %2 : vector<1x16xf32> to vector<16x16xf32>
    %5 = arith.addf %3, %4 : vector<16x16xf32>
    %cst_5 = arith.constant 0.000000e+00 : f32
    %6 = vector.broadcast %cst_5 : f32 to vector<16x16xf32>
    %7 = arith.cmpf ogt, %5, %6 : vector<16x16xf32>
    %cst_6 = arith.constant 2.000000e-01 : f32
    %8 = vector.broadcast %cst_6 : f32 to vector<16x16xf32>
    %9 = arith.mulf %8, %5 : vector<16x16xf32>
    %10 = arith.select %7, %5, %9 : vector<16x16xi1>, vector<16x16xf32>
    %c0_7 = arith.constant 0 : index
    %c0_8 = arith.constant 0 : index
    %11 = vector.load %arg3[%c0_7, %c0_8] : memref<16x8xf32, #tpu.memory_space<vmem>>, vector<16x8xf32>
    %c1 = arith.constant 1 : index
    %c0_9 = arith.constant 0 : index
    %12 = vector.load %arg7[%c1, %c0_9] : memref<5x64xf32, #tpu.memory_space<vmem>>, vector<1x8xf32>
    %cst_10 = arith.constant dense<0.000000e+00> : vector<16x8xf32>
    %13 = tpu.matmul %10, %11, %cst_10 {dimension_numbers = #tpu.dot_dimension_numbers<[1], [0], [0], [1], [0, 0, 1, 1], [], []>} : vector<16x16xf32>, vector<16x8xf32>, vector<16x8xf32> -> vector<16x8xf32>
    %14 = vector.broadcast %12 : vector<1x8xf32> to vector<16x8xf32>
    %15 = arith.addf %13, %14 : vector<16x8xf32>
    %cst_11 = arith.constant 0.000000e+00 : f32
    %16 = vector.broadcast %cst_11 : f32 to vector<16x8xf32>
    %17 = arith.cmpf ogt, %15, %16 : vector<16x8xf32>
    %cst_12 = arith.constant 2.000000e-01 : f32
    %18 = vector.broadcast %cst_12 : f32 to vector<16x8xf32>
    %19 = arith.mulf %18, %15 : vector<16x8xf32>
    %20 = arith.select %17, %15, %19 : vector<16x8xi1>, vector<16x8xf32>
    %c0_13 = arith.constant 0 : index
    %c0_14 = arith.constant 0 : index
    %21 = vector.load %arg4[%c0_13, %c0_14] : memref<8x4xf32, #tpu.memory_space<vmem>>, vector<8x4xf32>
    %c2 = arith.constant 2 : index
    %c0_15 = arith.constant 0 : index
    %22 = vector.load %arg7[%c2, %c0_15] : memref<5x64xf32, #tpu.memory_space<vmem>>, vector<1x4xf32>
    %cst_16 = arith.constant dense<0.000000e+00> : vector<16x4xf32>
    %23 = tpu.matmul %20, %21, %cst_16 {dimension_numbers = #tpu.dot_dimension_numbers<[1], [0], [0], [1], [0, 0, 1, 1], [], []>} : vector<16x8xf32>, vector<8x4xf32>, vector<16x4xf32> -> vector<16x4xf32>
    %24 = vector.broadcast %22 : vector<1x4xf32> to vector<16x4xf32>
    %25 = arith.addf %23, %24 : vector<16x4xf32>
    %cst_17 = arith.constant 0.000000e+00 : f32
    %26 = vector.broadcast %cst_17 : f32 to vector<16x4xf32>
    %27 = arith.cmpf ogt, %25, %26 : vector<16x4xf32>
    %cst_18 = arith.constant 2.000000e-01 : f32
    %28 = vector.broadcast %cst_18 : f32 to vector<16x4xf32>
    %29 = arith.mulf %28, %25 : vector<16x4xf32>
    %30 = arith.select %27, %25, %29 : vector<16x4xi1>, vector<16x4xf32>
    %c0_19 = arith.constant 0 : index
    %c0_20 = arith.constant 0 : index
    %31 = vector.load %arg5[%c0_19, %c0_20] : memref<4x64xf32, #tpu.memory_space<vmem>>, vector<4x64xf32>
    %c3 = arith.constant 3 : index
    %c0_21 = arith.constant 0 : index
    %32 = vector.load %arg7[%c3, %c0_21] : memref<5x64xf32, #tpu.memory_space<vmem>>, vector<1x64xf32>
    %cst_22 = arith.constant dense<0.000000e+00> : vector<16x64xf32>
    %33 = tpu.matmul %30, %31, %cst_22 {dimension_numbers = #tpu.dot_dimension_numbers<[1], [0], [0], [1], [0, 0, 1, 1], [], []>} : vector<16x4xf32>, vector<4x64xf32>, vector<16x64xf32> -> vector<16x64xf32>
    %34 = vector.broadcast %32 : vector<1x64xf32> to vector<16x64xf32>
    %35 = arith.addf %33, %34 : vector<16x64xf32>
    %cst_23 = arith.constant 0.000000e+00 : f32
    %36 = vector.broadcast %cst_23 : f32 to vector<16x64xf32>
    %37 = arith.cmpf ogt, %35, %36 : vector<16x64xf32>
    %cst_24 = arith.constant 2.000000e-01 : f32
    %38 = vector.broadcast %cst_24 : f32 to vector<16x64xf32>
    %39 = arith.mulf %38, %35 : vector<16x64xf32>
    %40 = arith.select %37, %35, %39 : vector<16x64xi1>, vector<16x64xf32>
    %c0_25 = arith.constant 0 : index
    %c0_26 = arith.constant 0 : index
    %41 = vector.load %arg6[%c0_25, %c0_26] : memref<64x64xf32, #tpu.memory_space<vmem>>, vector<64x64xf32>
    %c4 = arith.constant 4 : index
    %c0_27 = arith.constant 0 : index
    %42 = vector.load %arg7[%c4, %c0_27] : memref<5x64xf32, #tpu.memory_space<vmem>>, vector<1x64xf32>
    %cst_28 = arith.constant dense<0.000000e+00> : vector<16x64xf32>
    %43 = tpu.matmul %40, %41, %cst_28 {dimension_numbers = #tpu.dot_dimension_numbers<[1], [0], [0], [1], [0, 0, 1, 1], [], []>} : vector<16x64xf32>, vector<64x64xf32>, vector<16x64xf32> -> vector<16x64xf32>
    %44 = vector.broadcast %42 : vector<1x64xf32> to vector<16x64xf32>
    %45 = arith.addf %43, %44 : vector<16x64xf32>
    %cst_29 = arith.constant dense<0xFF800000> : vector<16xf32>
    %46 = vector.multi_reduction <maximumf>, %45, %cst_29 [1] : vector<16x64xf32> to vector<16xf32>
    %47 = vector.shape_cast %46 : vector<16xf32> to vector<16x1xf32>
    %48 = vector.broadcast %47 : vector<16x1xf32> to vector<16x64xf32>
    %49 = arith.subf %45, %48 : vector<16x64xf32>
    %50 = math.exp %49 : vector<16x64xf32>
    %cst_30 = arith.constant dense<0.000000e+00> : vector<16xf32>
    %51 = vector.multi_reduction <add>, %50, %cst_30 [1] : vector<16x64xf32> to vector<16xf32>
    %52 = vector.shape_cast %51 : vector<16xf32> to vector<16x1xf32>
    %53 = tpu.reciprocal %52 {approx = true} : vector<16x1xf32> -> vector<16x1xf32>
    %54 = arith.mulf %52, %53 : vector<16x1xf32>
    %cst_31 = arith.constant 2.000000e+00 : f32
    %55 = vector.broadcast %cst_31 : f32 to vector<16x1xf32>
    %56 = arith.subf %55, %54 : vector<16x1xf32>
    %57 = arith.mulf %53, %56 : vector<16x1xf32>
    %58 = vector.broadcast %57 : vector<16x1xf32> to vector<16x64xf32>
    %59 = arith.mulf %50, %58 : vector<16x64xf32>
    %c0_32 = arith.constant 0 : index
    %c0_33 = arith.constant 0 : index
    %60 = vector.load %arg8[%c0_32, %c0_33] : memref<16x64xf32, #tpu.memory_space<vmem>>, vector<16x64xf32>
    tpu.vector_store %arg8[%c0_32, %c0_33], %59 {strides = array<i32>} : memref<16x64xf32, #tpu.memory_space<vmem>>, vector<16x64xf32>,
    return
  }
  func.func @transform_0(%arg0: i32) -> (i32, i32) {
    %c0_i32 = arith.constant 0 : i32
    %c0_i32_0 = arith.constant 0 : i32
    return %arg0, %c0_i32 : i32, i32
  }
  func.func @transform_1(%arg0: i32) -> (i32, i32) {
    %c0_i32 = arith.constant 0 : i32
    %c0_i32_0 = arith.constant 0 : i32
    %c0_i32_1 = arith.constant 0 : i32
    return %c0_i32, %c0_i32_0 : i32, i32
  }
  func.func @transform_2(%arg0: i32) -> (i32, i32) {
    %c0_i32 = arith.constant 0 : i32
    %c0_i32_0 = arith.constant 0 : i32
    %c0_i32_1 = arith.constant 0 : i32
    return %c0_i32, %c0_i32_0 : i32, i32
  }
  func.func @transform_3(%arg0: i32) -> (i32, i32) {
    %c0_i32 = arith.constant 0 : i32
    %c0_i32_0 = arith.constant 0 : i32
    %c0_i32_1 = arith.constant 0 : i32
    return %c0_i32, %c0_i32_0 : i32, i32
  }
  func.func @transform_4(%arg0: i32) -> (i32, i32) {
    %c0_i32 = arith.constant 0 : i32
    %c0_i32_0 = arith.constant 0 : i32
    %c0_i32_1 = arith.constant 0 : i32
    return %c0_i32, %c0_i32_0 : i32, i32
  }
  func.func @transform_5(%arg0: i32) -> (i32, i32) {
    %c0_i32 = arith.constant 0 : i32
    %c0_i32_0 = arith.constant 0 : i32
    %c0_i32_1 = arith.constant 0 : i32
    return %c0_i32, %c0_i32_0 : i32, i32
  }
  func.func @transform_6(%arg0: i32) -> (i32, i32) {
    %c0_i32 = arith.constant 0 : i32
    %c0_i32_0 = arith.constant 0 : i32
    %c0_i32_1 = arith.constant 0 : i32
    return %c0_i32, %c0_i32_0 : i32, i32
  }
  func.func @transform_7(%arg0: i32) -> (i32, i32) {
    %c0_i32 = arith.constant 0 : i32
    %c0_i32_0 = arith.constant 0 : i32
    return %arg0, %c0_i32 : i32, i32
  }
}

</mosaic_0001>

<bundles_post_ra>
// kernel: tpu_custom_call.1
= control target key start
LH: loop header
LB: loop body
LE: loop exit
PB: predicated region body
PF: predicated region fallthrough
CT: control target
= control target key end

     0   :  { %vm42_vm0 = vcmask 523264   ;;  %s828_s0 = inlined_call_operand.vmem [shape: f32[16,64], index: 0, kind: input, shape index: {}]   ;;  %s829_s1 = inlined_call_operand.vmem [shape: f32[64,16], index: 1, kind: input, shape index: {}]   ;;  %s830_s2 = inlined_call_operand.vmem [shape: f32[16,8], index: 2, kind: input, shape index: {}]   ;;  %s831_s3 = inlined_call_operand.vmem [shape: f32[8,4], index: 3, kind: input, shape index: {}]   ;;  %s832_s4 = inlined_call_operand.vmem [shape: f32[4,64], index: 4, kind: input, shape index: {}]   ;;  %s833_s5 = inlined_call_operand.vmem [shape: f32[64,64], index: 5, kind: input, shape index: {}]   ;;  %s834_s6 = inlined_call_operand.vmem [shape: f32[5,64], index: 6, kind: input, shape index: {}]   ;;  %s835_s7 = inlined_call_operand.hbm [shape: f32[16,64], index: 7, kind: output, shape index: {}]  }
   0x1   :  { %v36_v0 = vld [vmem:[%s829_s1 + $0x38] sm:$0xff]  ;;  %v35_v1 = vld [vmem:[%s829_s1 + $0x30] sm:$0xff]  ;;  %v34_v2 = vld [vmem:[%s829_s1 + $0x28] sm:$0xff] }
   0x2   :  { %603 = vmatprep.subr.mxu0 %v36_v0  ;;  %v27_v3 = vld [vmem:[%s828_s0] sm:$0xff] }
   0x3   :  { %604 = vmatpush3.msra.mxu0 %v36_v0  ;;  %619 = vmatprep.mubr.msk.f32.mxu0 %vm42_vm0, %v27_v3 }
   0x4   :  { %605 = vmatprep.subr.mxu0 %v35_v1 }
   0x5   :  { %12 = vsyncpa [#allocation3], 0  ;;  %606 = vmatpush3.msra.mxu0 %v35_v1  ;;  %v33_v4 = vld [vmem:[%s829_s1 + $0x20] sm:$0xff]  ;;  %v32_v5 = vld [vmem:[%s829_s1 + $0x18] sm:$0xff]  ;;  %vm137_vm3 = vcmask 130048   ;;  %vm231_vm6 = vcmask 64512  }
   0x6   :  { %607 = vmatprep.subr.mxu0 %v34_v2  ;;  %v31_v6 = vld [vmem:[%s829_s1 + $0x10] sm:$0xff]  ;;  %v30_v7 = vld [vmem:[%s829_s1 + $0x8] sm:$0xff]  ;;  %v29_v8 = vld [vmem:[%s829_s1] sm:$0xff]  ;;  %vm332_vm7 = vcmask 1043456   ;;  %vm325_vm10 = vcmask 31744  }
   0x7   :  { %608 = vmatpush3.msra.mxu0 %v34_v2  ;;  %v28_v9 = vld [vmem:[%s828_s0 + $0x8] sm:$0xff]  ;;  %v130_v11 = vld [vmem:[%s830_s2] sm:$0xff]  ;;  %v424_v32 = vld [vmem:[%s833_s5 + $0x38] sm:$0xff] }
   0x8   :  { %609 = vmatprep.subr.mxu0 %v33_v4  ;;  %v131_v10 = vld [vmem:[%s830_s2 + $0x8] sm:$0xff]  ;;  %v557_v12 = vld [vmem:[%s834_s6] ss:$0 sm:$0xff]  ;;  %v560_v22 = vld [vmem:[%s834_s6 + $0x1] ss:$0 sm:$0xff] }
   0x9   :  { %610 = vmatpush3.msra.mxu0 %v33_v4  ;;  %v225_v21 = vld [vmem:[%s831_s3] sm:$0xff]  ;;  %v423_v42 = vld [vmem:[%s833_s5 + $0x30] sm:$0xff]  ;;  %v422_v43 = vld [vmem:[%s833_s5 + $0x28] sm:$0xff] }
   0xa   :  { %611 = vmatprep.subr.mxu0 %v32_v5  ;;  %629 = vmatprep.subr.mxu1 %v225_v21  ;;  %v319_v31 = vld [vmem:[%s832_s4] sm:$0xf]  ;;  %v420_v45 = vld [vmem:[%s833_s5 + $0x18] sm:$0xff]  ;;  %v419_v46 = vld [vmem:[%s833_s5 + $0x10] sm:$0xff] }
   0xb   :  { %612 = vmatpush3.msra.mxu0 %v32_v5  ;;  %630 = vmatpush3.msra.mxu1 %v225_v21  ;;  %v563_v33 = vld [vmem:[%s834_s6 + $0x2] ss:$0 sm:$0xff]  ;;  %v418_v47 = vld [vmem:[%s833_s5 + $0x8] sm:$0xff]  ;;  %v566_v49 = vld [vmem:[%s834_s6 + $0x3] ss:$0 sm:$0xff] }
   0xc   :  { %613 = vmatprep.subr.mxu0 %v31_v6  ;;  %634 = vmatprep.subr.msk.mxu1 %vm332_vm7, %v319_v31  ;;  %v421_v44 = vld [vmem:[%s833_s5 + $0x20] sm:$0xff] }
   0xd   :  { %614 = vmatpush3.msra.mxu0 %v31_v6  ;;  %v417_v48 = vld [vmem:[%s833_s5] sm:$0xff] }
   0xe   :  { %615 = vmatprep.subr.mxu0 %v30_v7  ;;  %v570_v59 = vld [vmem:[%s834_s6 + $0x4] ss:$0 sm:$0xff]  ;;  %s691_s6 = smov [#allocation2]  }
   0xf   :  { %616 = vmatpush3.msra.mxu0 %v30_v7  ;;  %s546_s25 = sshll.u32 %s691_s6, 4  ;;  %s547_s25 = int_to_ptr.vmem [resolvable:$true] %s546_s25 }
  0x10   :  { %617 = vmatprep.subr.mxu0 %v29_v8  ;;  %s669_s0 = scalar_lea.vmem %s547_s25, 256  ;;  %p674_p1 = scmp.lt.s32.totalorder %s547_s25, %s547_s25 }
  0x11   :  { %618 = vmatpush3.msra.mxu0 %v29_v8  ;;  %p670_p0 = scmp.ne.s32.totalorder %s547_s25, %s669_s0  ;;  %p675_p2 = scmp.lt.s32.totalorder %s669_s0, %s669_s0 }
  0x12   :  { %620 = vmatmul.mubr.msk.f32.vlgmr.msra.gmra.mxu0 %vm42_vm0, %v28_v9  ;;  %622 = vmatprep.subr.mxu0 %v131_v10 }
  0x13   :  { %623 = vmatpush3.msra.mxu0 %v131_v10  ;;  %p676_p3 = por %p675_p2, %p674_p1 }
  0x14   :  { %624 = vmatprep.subr.mxu0 %v130_v11 }
  0x15   :  { %625 = vmatpush3.msra.mxu0 %v130_v11  ;;  %p677_p4 = pnand %p676_p3, %p670_p0 }
  0xd2   :  { %v621_v13 = vpop.f32.mrf.mxu0 }
  0xd3   :  { %v121_v14 = vadd.f32 %v621_v13, %v557_v12 }
  0xd4   :  { %v115_v15 = vpop.f32.mrf.mxu0 }
  0xd5   :  { %v116_v16 = vadd.f32 %v557_v12, %v115_v15  ;;  %v127_v17 = vmul.f32 0.2, %v121_v14  ;;  %vm125_vm1 = vcmp.gt.f32.partialorder %v121_v14, 0.0 }
  0xd7   :  { %vm124_vm2 = vcmp.gt.f32.partialorder %v116_v16, 0.0  ;;  %v126_v18 = vmul.f32 0.2, %v116_v16  ;;  %v129_v20 = vsel %vm125_vm1, %v121_v14, %v127_v17 }
  0xd9   :  { %v128_v19 = vsel %vm124_vm2, %v116_v16, %v126_v18 }
  0xda   :  { %626 = vmatprep.mubr.msk.f32.mxu0 %vm137_vm3, %v128_v19 }
  0xdb   :  { %627 = vmatmul.mubr.msk.f32.vlgmr.msra.gmra.mxu0 %vm137_vm3, %v129_v20 }
 0x19b   :  { %v628_v23 = vpop.f32.mrf.mxu0 }
 0x19c   :  { %v216_v24 = vadd.f32 %v628_v23, %v560_v22 }
 0x19d   :  { %v210_v25 = vpop.f32.mrf.mxu0 }
 0x19e   :  { %v211_v26 = vadd.f32 %v560_v22, %v210_v25  ;;  %v222_v27 = vmul.f32 0.2, %v216_v24  ;;  %vm220_vm4 = vcmp.gt.f32.partialorder %v216_v24, 0.0 }
 0x1a0   :  { %vm219_vm5 = vcmp.gt.f32.partialorder %v211_v26, 0.0  ;;  %v221_v28 = vmul.f32 0.2, %v211_v26  ;;  %v224_v30 = vsel %vm220_vm4, %v216_v24, %v222_v27 }
 0x1a2   :  { %v223_v29 = vsel %vm219_vm5, %v211_v26, %v221_v28 }
 0x1a3   :  { %631 = vmatprep.mubr.msk.f32.mxu1 %vm231_vm6, %v223_v29 }
 0x1a4   :  { %632 = vmatmul.mubr.msk.f32.vlgmr.msra.gmra.mxu1 %vm231_vm6, %v224_v30 }
 0x1a5   :  { %635 = vmatpush3.msk.msra.mxu1 %vm332_vm7, %v319_v31 }
 0x1a6   :  { %639 = vmatprep.subr.mxu1 %v424_v32 }
 0x264   :  { %v633_v34 = vpop.f32.mrf.mxu1 }
 0x265   :  { %v310_v35 = vadd.f32 %v633_v34, %v563_v33 }
 0x266   :  { %v304_v36 = vpop.f32.mrf.mxu1 }
 0x267   :  { %v305_v37 = vadd.f32 %v563_v33, %v304_v36  ;;  %v316_v38 = vmul.f32 0.2, %v310_v35  ;;  %vm314_vm8 = vcmp.gt.f32.partialorder %v310_v35, 0.0 }
 0x269   :  { %vm313_vm9 = vcmp.gt.f32.partialorder %v305_v37, 0.0  ;;  %v315_v39 = vmul.f32 0.2, %v305_v37  ;;  %v318_v41 = vsel %vm314_vm8, %v310_v35, %v316_v38 }
 0x26b   :  { %v317_v40 = vsel %vm313_vm9, %v305_v37, %v315_v39 }
 0x26c   :  { %636 = vmatprep.mubr.msk.f32.mxu1 %vm325_vm10, %v317_v40 }
 0x26d   :  { %637 = vmatmul.mubr.msk.f32.vlgmr.msra.gmra.mxu1 %vm325_vm10, %v318_v41 }
 0x26e   :  { %640 = vmatpush3.msra.mxu1 %v424_v32 }
 0x26f   :  { %641 = vmatprep.subr.mxu1 %v423_v42 }
 0x270   :  { %642 = vmatpush3.msra.mxu1 %v423_v42 }
 0x271   :  { %643 = vmatprep.subr.mxu1 %v422_v43 }
 0x272   :  { %644 = vmatpush3.msra.mxu1 %v422_v43 }
 0x273   :  { %645 = vmatprep.subr.mxu1 %v421_v44 }
 0x274   :  { %646 = vmatpush3.msra.mxu1 %v421_v44 }
 0x275   :  { %647 = vmatprep.subr.mxu1 %v420_v45 }
 0x276   :  { %648 = vmatpush3.msra.mxu1 %v420_v45 }
 0x277   :  { %649 = vmatprep.subr.mxu1 %v419_v46 }
 0x278   :  { %650 = vmatpush3.msra.mxu1 %v419_v46 }
 0x279   :  { %651 = vmatprep.subr.mxu1 %v418_v47 }
 0x27a   :  { %652 = vmatpush3.msra.mxu1 %v418_v47 }
 0x27b   :  { %653 = vmatprep.subr.mxu1 %v417_v48 }
 0x27c   :  { %654 = vmatpush3.msra.mxu1 %v417_v48 }
 0x32d   :  { %v638_v50 = vpop.f32.mrf.mxu1 }
 0x32e   :  { %v408_v51 = vadd.f32 %v638_v50, %v566_v49 }
 0x32f   :  { %v402_v52 = vpop.f32.mrf.mxu1 }
 0x330   :  { %v403_v53 = vadd.f32 %v566_v49, %v402_v52  ;;  %v414_v54 = vmul.f32 0.2, %v408_v51  ;;  %vm412_vm11 = vcmp.gt.f32.partialorder %v408_v51, 0.0 }
 0x332   :  { %vm411_vm12 = vcmp.gt.f32.partialorder %v403_v53, 0.0  ;;  %v413_v55 = vmul.f32 0.2, %v403_v53  ;;  %v416_v57 = vsel %vm412_vm11, %v408_v51, %v414_v54 }
 0x334   :  { %v415_v56 = vsel %vm411_vm12, %v403_v53, %v413_v55 }
 0x335   :  { %655 = vmatprep.mubr.msk.f32.mxu1 %vm42_vm0, %v415_v56 }
 0x336   :  { %656 = vmatmul.mubr.msk.f32.vlgmr.msra.gmra.mxu1 %vm42_vm0, %v416_v57 }
 0x3f6   :  { %v657_v58 = vpop.f32.mrf.mxu1 }
 0x3f7   :  { %v508_v62 = vadd.f32 %v657_v58, %v570_v59 }
 0x3f8   :  { %v502_v60 = vpop.f32.mrf.mxu1 }
 0x3f9   :  { %v503_v61 = vadd.f32 %v570_v59, %v502_v60  ;;  %v514_v0 = vsel %vm42_vm0, %v508_v62, -inf }
 0x3fb   :  { %v511_v63 = vsel %vm42_vm0, %v503_v61, -inf }
 0x3fc   :  { %512 = vmax.xlane.f32.xlu0 %v511_v63 }
 0x400   :  { %515 = vmax.xlane.f32.xlu0 %v514_v0 }
 0x485   :  { %v513_v1 = vpop.xlane.xlu0 %512 }
 0x486   :  { %v517_v2 = vsub.f32 %v503_v61, %v513_v1 }
 0x488   :  { %v519_v3 = vmul.f32 1.442695, %v517_v2 }
 0x489   :  { %v516_v4 = vpop.xlane.xlu0 %515 }
 0x48a   :  { %661 = vpow2.f32 %v519_v3  ;;  %v518_v5 = vsub.f32 %v508_v62, %v516_v4 }
 0x48c   :  { %v521_v6 = vmul.f32 1.442695, %v518_v5 }
 0x48e   :  { %663 = vpow2.f32 %v521_v6 }
 0x497   :  { %v662_v7 = vpop.eup %661 }
 0x498   :  { %v523_v8 = vsel %vm42_vm0, %v662_v7, 0.0 }
 0x499   :  { %524 = vadd.xlane.f32.xlu1 %v523_v8 }
 0x49b   :  { %v664_v9 = vpop.eup %663 }
 0x49c   :  { %v526_v10 = vsel %vm42_vm0, %v664_v9, 0.0 }
 0x49d   :  { %527 = vadd.xlane.f32.xlu1 %v526_v10 }
 0x522   :  { %v525_v11 = vpop.xlane.xlu1 %524 }
 0x523   :  { %665 = vrcp.f32 %v525_v11 }
 0x526   :  { %v528_v12 = vpop.xlane.xlu1 %527 }
 0x527   :  { %667 = vrcp.f32 %v528_v12 }
 0x530   :  { %v666_v13 = vpop.eup %665 }
 0x531   :  { %v531_v14 = vmul.f32 %v666_v13, %v525_v11 }
 0x533   :  { %v533_v15 = vsub.f32 2.0, %v531_v14 }
 0x534   :  { %v668_v16 = vpop.eup %667 }
 0x535   :  { %v535_v17 = vmul.f32 %v666_v13, %v533_v15  ;;  %v532_v18 = vmul.f32 %v668_v16, %v528_v12 }
 0x537   :  { %v537_v19 = vmul.f32 %v662_v7, %v535_v17  ;;  %v534_v20 = vsub.f32 2.0, %v532_v18 }
 0x539   :  { %539 = vst.msk [vmem:[#allocation2] sm:$0xff] %vm42_vm0, %v537_v19  ;;  %v536_v21 = vmul.f32 %v668_v16, %v534_v20 }
 0x53b   :  { %v538_v22 = vmul.f32 %v664_v9, %v536_v21 }
 0x53d   :  { %540 = vst.msk [vmem:[#allocation2 + $0x8] sm:$0xff] %vm42_vm0, %v538_v22 }
 0x53e   :  { %680 = shalt.err (!%p677_p4)
}
 0x53f   :  { %s692_s2 = smov 128   ;;  %s693_s26 = smov 8  }
 0x540   :  { %552 = dma.vmem_to_hbm [thread:$0]  %s547_s25, 256, %s835_s7, [#allocation3], %s692_s2, %s692_s2, %s693_s26  }
 0x541   :  { %689 = dma.done.wait [#allocation3], 256  }
 0x542   :  { %690 = vsyncadd [#allocation3], 4294967040 }
 0x543   :  { %556 = vsyncpa [#allocation3], 1 }

</bundles_post_ra>
